<compile_context>
chip_gen: v5e
topology: v5e:2x2
jax: 0.10.0
libtpu: 0.0.40
codegen_flags: <defaults>
</compile_context>

<pallas_src>
import numpy as np
import jax
import jax.numpy as jnp
from jax import lax
from jax.experimental import pallas as pl
from jax.experimental.pallas import tpu as pltpu

# ---- Problem sizes (small, consistent with the module) ----------------------
N, H, W = 2, 16, 16          # batch, spatial (in_dim = 16)
CIN, C1 = 4, 8               # in_ch, ch1
KH = KW = 3                  # conv1 kernel
POOL = 8                     # AvgPool2d(8)
HP, WP = H // POOL, W // POOL            # 2, 2
OUT_DIM = C1 * HP * WP                   # ch1 * (in_dim // 8) ** 2 = 32
NUM_CLASSES = 10
EPS = 1e-5
NEG = -1e30                              # stand-in for -inf max-pool padding

LANES = W * C1                           # 128 (lane-dense working width)
KROW = (W + 2) * CIN                     # 72  (per-tap contraction)
KCAT = KH * KROW                         # 216 (3 vertical taps concatenated)
KPAD = 256                               # contraction zero-padded to lane tile


# =============================================================================
# Fused kernel: conv1+bn1 (+block) -> maxpool(3,1,1) -> bn2+avgpool+classifier
# =============================================================================
def fused_kernel(xcat_ref, wcat_ref, shift_ref, acat_ref, bias_ref, out_ref):
    # xcat_ref : (N*H, 256)  padded-input taps, cols = [ky=0|ky=1|ky=2] blocks
    # wcat_ref : (256, 384)  band conv weights (bn1 scale folded); output
    #                        lane slabs = [conv(w) | conv(w+1) | conv(w-1)]
    # shift_ref: (1, 128)    conv bias + bn1 shift, tiled over w
    # acat_ref : (256, 10)   bn2 + avgpool + NCHW flatten + Linear folded
    # bias_ref : (1, 10)
    # out_ref  : (N, 10)

    # ---- conv1 (bn1 scale folded) as ONE band matmul ------------------------
    acc = jnp.dot(xcat_ref[...], wcat_ref[...],
                  preferred_element_type=jnp.float32)          # (32, 384)
    c_slab = acc[:, 0:LANES]              # conv (scaled) at (h, w)
    r_slab = acc[:, LANES:2 * LANES]      # conv (scaled) at (h, w+1)
    l_slab = acc[:, 2 * LANES:3 * LANES]  # conv (scaled) at (h, w-1)

    # TODO(synk): ConvPcDEQ1Block definition not provided; treated as identity.

    # ---- horizontal 3-tap max (w direction); boundaries via lane masks ------
    lane = lax.broadcasted_iota(jnp.int32, (1, LANES), 1)      # lane = w*C1 + c
    hmax = jnp.maximum(
        c_slab,
        jnp.maximum(jnp.where(lane < (W - 1) * C1, r_slab, NEG),   # w <= 14
                    jnp.where(lane >= C1, l_slab, NEG)))           # w >= 1

    # ---- vertical 3-tap max (h direction) via NEG guard rows + XLU rolls ----
    neg_blk = jnp.full((POOL, LANES), NEG, jnp.float32)
    parts = []
    for n in range(N):                                   # static, N = 2
        parts.append(hmax[n * H:(n + 1) * H, :])
        parts.append(neg_blk)                            # guard after each image
    vbuf = jnp.concatenate(parts, axis=0)                # (N*(H+POOL), 128) = (48,128)
    rows = N * (H + POOL)
    vmax = jnp.maximum(vbuf,
                       jnp.maximum(pltpu.roll(vbuf, 1, 0),
                                   pltpu.roll(vbuf, rows - 1, 0)))
    # per-channel constant (conv bias + bn1 shift) commutes with both maxes
    vmax = vmax + shift_ref[...]

    # ---- avgpool(8) over h -> 8-row block sums (1/64, bn2, flatten folded) --
    feat_rows = []
    for n in range(N):
        blk = vmax[n * (H + POOL):n * (H + POOL) + H, :]           # (16, 128)
        s_top = jnp.sum(blk[0:POOL, :], axis=0, keepdims=True)     # (1, 128)
        s_bot = jnp.sum(blk[POOL:2 * POOL, :], axis=0, keepdims=True)
        feat_rows.append(jnp.concatenate([s_top, s_bot], axis=1))  # (1, 256)
    feat = jnp.concatenate(feat_rows, axis=0)                      # (N, 256)

    # ---- bn2 + avgpool(w) + flatten + Linear as one matmul ------------------
    out_ref[...] = jnp.dot(feat, acat_ref[...],
                           preferred_element_type=jnp.float32) + bias_ref[...]


# =============================================================================
# Wrapper-side (one-time) parameter folding / layout prep
# =============================================================================
def _fold_bn(gamma, beta, mean, var):
    s = gamma / jnp.sqrt(var + EPS)
    return s, beta - mean * s


def _build_band_weights(conv_w, s1):
    """(KH*KROW, 3*W*C1) band matrix, bn1 scale folded in.

    Output column slab s=0 gives conv at w, s=1 at w+1, s=2 at w-1
    (out-of-image columns are garbage and are masked with NEG in-kernel)."""
    w_scaled = conv_w.astype(jnp.float32) * s1[:, None, None, None]  # (C1,CIN,KH,KW)
    off = np.array([0, 1, -1])                                       # center, w+1, w-1
    wp = np.arange(W + 2)[None, :, None]                             # (1,18,1)
    wo = np.arange(W)[None, None, :]                                 # (1,1,16)
    kx = wp - wo - off[:, None, None]                                # (3,18,16)
    valid = ((kx >= 0) & (kx < KW)).astype(np.float32)
    kx_c = np.clip(kx, 0, KW - 1)
    g = w_scaled[:, :, :, kx_c]                                      # (C1,CIN,KH,3,18,16)
    g = g * jnp.asarray(valid)[None, None, None]
    g = jnp.transpose(g, (2, 4, 1, 3, 5, 0))                         # (KH,wp,CIN,s,w,C1)
    g = g.reshape(KCAT, 3 * LANES)                                   # (216, 384)
    return jnp.pad(g, ((0, KPAD - KCAT), (0, 0)))                    # (256, 384)


def _fold_classifier(cls_w, cls_b, s2, t2):
    """Fold bn2 + avgpool(1/64) + NCHW flatten into the Linear layer."""
    w4 = cls_w.reshape(NUM_CLASSES, C1, HP, WP)                      # [o,c,i,j]
    a = jnp.transpose(w4, (2, 3, 1, 0)) * (s2 / (POOL * POOL))[None, None, :, None]
    a = jnp.repeat(a, POOL, axis=1)                                  # j -> w : (HP,W,C1,10)
    acat = a.reshape(HP * LANES, NUM_CLASSES)                        # (256, 10)
    bias = cls_b + jnp.dot(w4.sum(axis=(2, 3)), t2,                  # avgpool of t2 == t2
                           precision=lax.Precision.HIGHEST)
    return acat, bias.reshape(1, NUM_CLASSES)


def _build_input_taps(x_nchw):
    """NCHW -> zero-padded NHWC taps, 3 vertical taps concatenated on lanes."""
    x = jnp.transpose(x_nchw, (0, 2, 3, 1)).astype(jnp.float32)      # (N,H,W,CIN)
    xp = jnp.pad(x, ((0, 0), (1, 1), (1, 1), (0, 0)))                # (N,H+2,W+2,CIN)
    taps = [xp[:, ky:ky + H].reshape(N * H, KROW) for ky in range(KH)]
    xcat = jnp.concatenate(taps, axis=1)                             # (32, 216)
    return jnp.pad(xcat, ((0, 0), (0, KPAD - KCAT)))                 # (32, 256)


@jax.jit
def single_conv_pcdeq1_forward(x_nchw, p):
    s1, t1 = _fold_bn(p["bn1_gamma"], p["bn1_beta"], p["bn1_mean"], p["bn1_var"])
    s2, t2 = _fold_bn(p["bn2_gamma"], p["bn2_beta"], p["bn2_mean"], p["bn2_var"])

    wcat = _build_band_weights(p["conv1_w"], s1)                     # (256, 384)
    shift_row = jnp.tile(p["conv1_b"] * s1 + t1, W).reshape(1, LANES)
    acat, bias = _fold_classifier(p["cls_w"], p["cls_b"], s2, t2)
    xcat = _build_input_taps(x_nchw)                                 # (32, 256)

    vmem = pl.BlockSpec(memory_space=pltpu.MemorySpace.VMEM)
    return pl.pallas_call(
        fused_kernel,
        out_shape=jax.ShapeDtypeStruct((N, NUM_CLASSES), jnp.float32),
        in_specs=[vmem] * 5,
        out_specs=vmem,
    )(xcat, wcat, shift_row, acat, bias)


# =============================================================================
# Pure-JAX reference (PyTorch NCHW semantics) for a sanity check
# =============================================================================
def reference_forward(x_nchw, p):
    y = lax.conv_general_dilated(
        x_nchw, p["conv1_w"], (1, 1), "SAME",
        dimension_numbers=("NCHW", "OIHW", "NCHW"),
        precision=lax.Precision.HIGHEST)
    y = y + p["conv1_b"].reshape(1, C1, 1, 1)

    def bn(z, g, b, mu, var):
        s = g / jnp.sqrt(var + EPS)
        return (z - mu.reshape(1, C1, 1, 1)) * s.reshape(1, C1, 1, 1) \
            + b.reshape(1, C1, 1, 1)

    y = bn(y, p["bn1_gamma"], p["bn1_beta"], p["bn1_mean"], p["bn1_var"])
    # block = identity (see TODO above)
    y = lax.reduce_window(y, -jnp.inf, lax.max, (1, 1, 3, 3), (1, 1, 1, 1), "SAME")
    y = bn(y, p["bn2_gamma"], p["bn2_beta"], p["bn2_mean"], p["bn2_var"])
    y = lax.reduce_window(y, 0.0, lax.add, (1, 1, POOL, POOL),
                          (1, 1, POOL, POOL), "VALID") / (POOL * POOL)
    feat = y.reshape(N, -1)                       # NCHW flatten: c-major
    return jnp.dot(feat, p["cls_w"].T, precision=lax.Precision.HIGHEST) + p["cls_b"]


# =============================================================================
def make_params(key):
    ks = jax.random.split(key, 12)
    f32 = jnp.float32
    return {
        "conv1_w":  0.1 * jax.random.normal(ks[0], (C1, CIN, KH, KW), f32),
        "conv1_b":  0.1 * jax.random.normal(ks[1], (C1,), f32),
        "bn1_gamma": 1.0 + 0.1 * jax.random.normal(ks[2], (C1,), f32),
        "bn1_beta": 0.1 * jax.random.normal(ks[3], (C1,), f32),
        "bn1_mean": 0.1 * jax.random.normal(ks[4], (C1,), f32),
        "bn1_var":  0.5 + jnp.abs(jax.random.normal(ks[5], (C1,), f32)),
        "bn2_gamma": 1.0 + 0.1 * jax.random.normal(ks[6], (C1,), f32),
        "bn2_beta": 0.1 * jax.random.normal(ks[7], (C1,), f32),
        "bn2_mean": 0.1 * jax.random.normal(ks[8], (C1,), f32),
        "bn2_var":  0.5 + jnp.abs(jax.random.normal(ks[9], (C1,), f32)),
        "cls_w":    0.1 * jax.random.normal(ks[10], (NUM_CLASSES, OUT_DIM), f32),
        "cls_b":    0.1 * jax.random.normal(ks[11], (NUM_CLASSES,), f32),
    }


if __name__ == "__main__":
    key = jax.random.PRNGKey(0)
    k_x, k_p = jax.random.split(key)
    x = jax.random.normal(k_x, (N, CIN, H, W), jnp.float32)
    params = make_params(k_p)

    out = jax.block_until_ready(single_conv_pcdeq1_forward(x, params))
    assert out.shape == (N, NUM_CLASSES), out.shape

    ref = jax.block_until_ready(reference_forward(x, params))
    err = float(jnp.max(jnp.abs(out - ref)))
    assert jnp.allclose(out, ref, atol=2e-3, rtol=2e-3), ("mismatch vs reference", err)

    print("KERNEL_OK")
</pallas_src>

<mosaic_0001>
module attributes {stable_mosaic.version = 11 : i64} {
  func.func @fused_kernel(%arg0: memref<32x256xf32, #tpu.memory_space<vmem>>, %arg1: memref<256x384xf32, #tpu.memory_space<vmem>>, %arg2: memref<1x128xf32, #tpu.memory_space<vmem>>, %arg3: memref<256x10xf32, #tpu.memory_space<vmem>>, %arg4: memref<1x10xf32, #tpu.memory_space<vmem>>, %arg5: memref<2x10xf32, #tpu.memory_space<vmem>>) attributes {dimension_semantics = [], scalar_prefetch = 0 : i64, scratch_operands = 0 : i64, tpu.core_type = #tpu.core_type<tc>} {
    %c0 = arith.constant 0 : index
    %c0_0 = arith.constant 0 : index
    %0 = vector.load %arg0[%c0, %c0_0] : memref<32x256xf32, #tpu.memory_space<vmem>>, vector<32x256xf32>
    %c0_1 = arith.constant 0 : index
    %c0_2 = arith.constant 0 : index
    %1 = vector.load %arg1[%c0_1, %c0_2] : memref<256x384xf32, #tpu.memory_space<vmem>>, vector<256x384xf32>
    %cst = arith.constant dense<0.000000e+00> : vector<32x384xf32>
    %2 = tpu.matmul %0, %1, %cst {dimension_numbers = #tpu.dot_dimension_numbers<[1], [0], [0], [1], [0, 0, 1, 1], [], []>} : vector<32x256xf32>, vector<256x384xf32>, vector<32x384xf32> -> vector<32x384xf32>
    %3 = vector.extract_strided_slice %2 {offsets = [0, 0], sizes = [32, 128], strides = [1, 1]} : vector<32x384xf32> to vector<32x128xf32>
    %4 = vector.extract_strided_slice %2 {offsets = [0, 128], sizes = [32, 128], strides = [1, 1]} : vector<32x384xf32> to vector<32x128xf32>
    %5 = vector.extract_strided_slice %2 {offsets = [0, 256], sizes = [32, 128], strides = [1, 1]} : vector<32x384xf32> to vector<32x128xf32>
    %6 = tpu.iota {dimensions = array<i32: 1>} : vector<1x128xi32>
    %c120_i32 = arith.constant 120 : i32
    %7 = vector.broadcast %c120_i32 : i32 to vector<1x128xi32>
    %8 = arith.cmpi slt, %6, %7 : vector<1x128xi32>
    %cst_3 = arith.constant -1.000000e+30 : f32
    %9 = vector.shape_cast %8 : vector<1x128xi1> to vector<1x128xi1>
    %10 = vector.broadcast %9 : vector<1x128xi1> to vector<32x128xi1>
    %11 = vector.broadcast %cst_3 : f32 to vector<32x128xf32>
    %12 = arith.select %10, %4, %11 : vector<32x128xi1>, vector<32x128xf32>
    %c8_i32 = arith.constant 8 : i32
    %13 = vector.broadcast %c8_i32 : i32 to vector<1x128xi32>
    %14 = arith.cmpi sge, %6, %13 : vector<1x128xi32>
    %cst_4 = arith.constant -1.000000e+30 : f32
    %15 = vector.shape_cast %14 : vector<1x128xi1> to vector<1x128xi1>
    %16 = vector.broadcast %15 : vector<1x128xi1> to vector<32x128xi1>
    %17 = vector.broadcast %cst_4 : f32 to vector<32x128xf32>
    %18 = arith.select %16, %5, %17 : vector<32x128xi1>, vector<32x128xf32>
    %19 = arith.maximumf %12, %18 : vector<32x128xf32>
    %20 = arith.maximumf %3, %19 : vector<32x128xf32>
    %cst_5 = arith.constant -1.000000e+30 : f32
    %21 = vector.broadcast %cst_5 : f32 to vector<8x128xf32>
    %22 = vector.extract_strided_slice %20 {offsets = [0, 0], sizes = [16, 128], strides = [1, 1]} : vector<32x128xf32> to vector<16x128xf32>
    %23 = vector.extract_strided_slice %20 {offsets = [16, 0], sizes = [16, 128], strides = [1, 1]} : vector<32x128xf32> to vector<16x128xf32>
    %24 = tpu.concatenate %22, %21, %23, %21 in 0 : vector<16x128xf32>, vector<8x128xf32>, vector<16x128xf32>, vector<8x128xf32> -> vector<48x128xf32>
    %c1_i32 = arith.constant 1 : i32
    %25 = tpu.dynamic_rotate %24 by %c1_i32 dim 0 : vector<48x128xf32>, i32 -> vector<48x128xf32>
    %c47_i32 = arith.constant 47 : i32
    %26 = tpu.dynamic_rotate %24 by %c47_i32 dim 0 : vector<48x128xf32>, i32 -> vector<48x128xf32>
    %27 = arith.maximumf %25, %26 : vector<48x128xf32>
    %28 = arith.maximumf %24, %27 : vector<48x128xf32>
    %c0_6 = arith.constant 0 : index
    %c0_7 = arith.constant 0 : index
    %29 = vector.load %arg2[%c0_6, %c0_7] : memref<1x128xf32, #tpu.memory_space<vmem>>, vector<1x128xf32>
    %30 = vector.broadcast %29 : vector<1x128xf32> to vector<48x128xf32>
    %31 = arith.addf %28, %30 : vector<48x128xf32>
    %32 = vector.extract_strided_slice %31 {offsets = [0, 0], sizes = [16, 128], strides = [1, 1]} : vector<48x128xf32> to vector<16x128xf32>
    %33 = vector.extract_strided_slice %32 {offsets = [0, 0], sizes = [8, 128], strides = [1, 1]} : vector<16x128xf32> to vector<8x128xf32>
    %cst_8 = arith.constant dense<0.000000e+00> : vector<128xf32>
    %34 = vector.multi_reduction <add>, %33, %cst_8 [0] : vector<8x128xf32> to vector<128xf32>
    %35 = vector.shape_cast %34 : vector<128xf32> to vector<1x128xf32>
    %36 = vector.extract_strided_slice %32 {offsets = [8, 0], sizes = [8, 128], strides = [1, 1]} : vector<16x128xf32> to vector<8x128xf32>
    %cst_9 = arith.constant dense<0.000000e+00> : vector<128xf32>
    %37 = vector.multi_reduction <add>, %36, %cst_9 [0] : vector<8x128xf32> to vector<128xf32>
    %38 = vector.shape_cast %37 : vector<128xf32> to vector<1x128xf32>
    %39 = tpu.concatenate %35, %38 in 1 : vector<1x128xf32>, vector<1x128xf32> -> vector<1x256xf32>
    %40 = vector.extract_strided_slice %31 {offsets = [24, 0], sizes = [16, 128], strides = [1, 1]} : vector<48x128xf32> to vector<16x128xf32>
    %41 = vector.extract_strided_slice %40 {offsets = [0, 0], sizes = [8, 128], strides = [1, 1]} : vector<16x128xf32> to vector<8x128xf32>
    %cst_10 = arith.constant dense<0.000000e+00> : vector<128xf32>
    %42 = vector.multi_reduction <add>, %41, %cst_10 [0] : vector<8x128xf32> to vector<128xf32>
    %43 = vector.shape_cast %42 : vector<128xf32> to vector<1x128xf32>
    %44 = vector.extract_strided_slice %40 {offsets = [8, 0], sizes = [8, 128], strides = [1, 1]} : vector<16x128xf32> to vector<8x128xf32>
    %cst_11 = arith.constant dense<0.000000e+00> : vector<128xf32>
    %45 = vector.multi_reduction <add>, %44, %cst_11 [0] : vector<8x128xf32> to vector<128xf32>
    %46 = vector.shape_cast %45 : vector<128xf32> to vector<1x128xf32>
    %47 = tpu.concatenate %43, %46 in 1 : vector<1x128xf32>, vector<1x128xf32> -> vector<1x256xf32>
    %48 = tpu.concatenate %39, %47 in 0 : vector<1x256xf32>, vector<1x256xf32> -> vector<2x256xf32>
    %c0_12 = arith.constant 0 : index
    %c0_13 = arith.constant 0 : index
    %49 = vector.load %arg3[%c0_12, %c0_13] : memref<256x10xf32, #tpu.memory_space<vmem>>, vector<256x10xf32>
    %cst_14 = arith.constant dense<0.000000e+00> : vector<2x10xf32>
    %50 = tpu.matmul %48, %49, %cst_14 {dimension_numbers = #tpu.dot_dimension_numbers<[1], [0], [0], [1], [0, 0, 1, 1], [], []>} : vector<2x256xf32>, vector<256x10xf32>, vector<2x10xf32> -> vector<2x10xf32>
    %c0_15 = arith.constant 0 : index
    %c0_16 = arith.constant 0 : index
    %51 = vector.load %arg4[%c0_15, %c0_16] : memref<1x10xf32, #tpu.memory_space<vmem>>, vector<1x10xf32>
    %52 = vector.broadcast %51 : vector<1x10xf32> to vector<2x10xf32>
    %53 = arith.addf %50, %52 : vector<2x10xf32>
    %c0_17 = arith.constant 0 : index
    %c0_18 = arith.constant 0 : index
    %54 = vector.load %arg5[%c0_17, %c0_18] : memref<2x10xf32, #tpu.memory_space<vmem>>, vector<2x10xf32>
    tpu.vector_store %arg5[%c0_17, %c0_18], %53 {strides = array<i32>} : memref<2x10xf32, #tpu.memory_space<vmem>>, vector<2x10xf32>,
    return
  }
}

</mosaic_0001>

<bundles_post_ra>
// kernel: tile.8
= control target key start
LH: loop header
LB: loop body
LE: loop exit
PB: predicated region body
PF: predicated region fallthrough
CT: control target
= control target key end

     0   :  { %s28_s0 = inlined_call_operand.vmem [shape: f32[8], index: 0, kind: input, shape index: {}]   ;;  %s29_s1 = inlined_call_operand.vmem [shape: f32[16,8], index: 1, kind: output, shape index: {}]  }
   0x1   :  { %v4_v0 = vld [vmem:[%s28_s0] ss:$0 sm:$0xff] }
   0x2   :  { %5 = vst [vmem:[%s29_s1] sm:$0xff] %v4_v0 }
   0x3   :  { %8 = vst [vmem:[%s29_s1 + $0x8] sm:$0xff] %v4_v0 }

// kernel: tile.9
= control target key start
LH: loop header
LB: loop body
LE: loop exit
PB: predicated region body
PF: predicated region fallthrough
CT: control target
= control target key end

     0   :  { %s131_s10 = smov 120   ;;  %s132_s11 = smov 104   ;;  %vm3_vm0 = vcmask 64512   ;;  %vm9_vm1 = vcmask 1048512   ;;  %vm15_vm2 = vcmask 982912   ;;  %vm21_vm3 = vcmask 917312   ;;  %s207_s0 = inlined_call_operand.vmem [shape: f32[16,8], index: 0, kind: input, shape index: {}]   ;;  %s208_s1 = inlined_call_operand.vmem [shape: f32[1,128], index: 1, kind: output, shape index: {}]  }
   0x1   :  { %v101_v0 = vld [vmem:[%s207_s0 + $0xf] sm:$0x1]   ;;  %v103_v1 = vld [vmem:[%s207_s0 + $0xd] sm:$0x1]   ;;  %v105_v2 = vld [vmem:[%s207_s0 + $0xb] sm:$0x1]  }
   0x2   :  { %7 = vrot.lane.b32.xlu0 %v101_v0, %s131_s10  ;;  %19 = vrot.lane.b32.xlu1 %v103_v1, %s132_s11  ;;  %s133_s14 = smov 88   ;;  %v102_v3 = vld [vmem:[%s207_s0 + $0xe] sm:$0x1]   ;;  %v104_v4 = vld [vmem:[%s207_s0 + $0xc] sm:$0x1]   ;;  %s134_s19 = smov 112  }
   0x3   :  { %31 = vrot.lane.b32.xlu2 %v105_v2, %s133_s14  ;;  %s135_s20 = smov 96   ;;  %v106_v5 = vld [vmem:[%s207_s0 + $0xa] sm:$0x1]   ;;  %s136_s23 = smov 80   ;;  %v107_v6 = vld [vmem:[%s207_s0 + $0x9] sm:$0x1]  }
   0x4   :  { %v108_v7 = vld [vmem:[%s207_s0 + $0x8] sm:$0x1]   ;;  %s137_s28 = smov 72   ;;  %s138_s29 = smov 64   ;;  %v109_v8 = vld [vmem:[%s207_s0 + $0x7] sm:$0x1]  }
   0x5   :  { %s139_s3 = smov 56   ;;  %v110_v9 = vld [vmem:[%s207_s0 + $0x6] sm:$0x1]   ;;  %v111_v10 = vld [vmem:[%s207_s0 + $0x5] sm:$0x1]   ;;  %s140_s8 = smov 48  }
   0x6   :  { %s141_s9 = smov 40   ;;  %v112_v11 = vld [vmem:[%s207_s0 + $0x4] sm:$0x1]   ;;  %s142_s12 = smov 32   ;;  %v113_v12 = vld [vmem:[%s207_s0 + $0x3] sm:$0x1]  }
   0x7   :  { %v114_v13 = vld [vmem:[%s207_s0 + $0x2] sm:$0x1]   ;;  %s143_s17 = smov 24   ;;  %s144_s18 = smov 16   ;;  %v115_v14 = vld [vmem:[%s207_s0 + $0x1] sm:$0x1]  }
   0x8   :  { %s145_s21 = smov 8   ;;  %v2_v15 = vld [vmem:[%s207_s0] sm:$0x1]   ;;  %vm27_vm4 = vcmask 851712   ;;  %vm33_vm5 = vcmask 786112   ;;  %vm39_vm6 = vcmask 720512  }
   0x9   :  { %4 = vst.msk [vmem:[#allocation0] sm:$0x1] %vm3_vm0, %v2_v15   ;;  %vm45_vm7 = vcmask 654912   ;;  %vm51_vm8 = vcmask 589312   ;;  %vm57_vm9 = vcmask 523712   ;;  %vm63_vm10 = vcmask 458112  }
   0xa   :  { %13 = vrot.lane.b32.xlu0 %v102_v3, %s134_s19  ;;  %25 = vrot.lane.b32.xlu1 %v104_v4, %s135_s20  ;;  %vm69_vm11 = vcmask 392512   ;;  %vm75_vm12 = vcmask 326912   ;;  %vm81_vm13 = vcmask 261312   ;;  %vm87_vm14 = vcmask 195712  }
   0xb   :  { %37 = vrot.lane.b32.xlu2 %v106_v5, %s136_s23  ;;  %vm93_vm15 = vcmask 130112  }
  0x12   :  { %43 = vrot.lane.b32.xlu0 %v107_v6, %s137_s28  ;;  %49 = vrot.lane.b32.xlu1 %v108_v7, %s138_s29 }
  0x13   :  { %55 = vrot.lane.b32.xlu2 %v109_v8, %s139_s3 }
  0x1a   :  { %61 = vrot.lane.b32.xlu0 %v110_v9, %s140_s8  ;;  %67 = vrot.lane.b32.xlu1 %v111_v10, %s141_s9 }
  0x1b   :  { %73 = vrot.lane.b32.xlu2 %v112_v11, %s142_s12 }
  0x22   :  { %79 = vrot.lane.b32.xlu0 %v113_v12, %s143_s17  ;;  %85 = vrot.lane.b32.xlu1 %v114_v13, %s144_s18 }
  0x23   :  { %91 = vrot.lane.b32.xlu2 %v115_v14, %s145_s21 }
  0x5d   :  { %v32_v16 = vpop.permute.xlu2 %31  }
  0x65   :  { %v38_v17 = vpop.permute.xlu2 %37  }
  0x6d   :  { %v56_v18 = vpop.permute.xlu2 %55  }
  0x74   :  { %v8_v19 = vpop.permute.xlu0 %7   ;;  %v20_v20 = vpop.permute.xlu1 %19  }
  0x75   :  { %10 = vst.msk [vmem:[#allocation0] sm:$0x1] %vm9_vm1, %v8_v19   ;;  %v74_v21 = vpop.permute.xlu2 %73  }
  0x7c   :  { %v14_v22 = vpop.permute.xlu0 %13   ;;  %v26_v23 = vpop.permute.xlu1 %25  }
  0x7d   :  { %16 = vst.msk [vmem:[#allocation0] sm:$0x1] %vm15_vm2, %v14_v22   ;;  %v92_v24 = vpop.permute.xlu2 %91  }
  0x7e   :  { %22 = vst.msk [vmem:[#allocation0] sm:$0x1] %vm21_vm3, %v20_v20  }
  0x7f   :  { %28 = vst.msk [vmem:[#allocation0] sm:$0x1] %vm27_vm4, %v26_v23  }
  0x80   :  { %34 = vst.msk [vmem:[#allocation0] sm:$0x1] %vm33_vm5, %v32_v16  }
  0x81   :  { %40 = vst.msk [vmem:[#allocation0] sm:$0x1] %vm39_vm6, %v38_v17  }
  0x84   :  { %v44_v25 = vpop.permute.xlu0 %43   ;;  %v50_v26 = vpop.permute.xlu1 %49  }
  0x85   :  { %46 = vst.msk [vmem:[#allocation0] sm:$0x1] %vm45_vm7, %v44_v25  }
  0x86   :  { %52 = vst.msk [vmem:[#allocation0] sm:$0x1] %vm51_vm8, %v50_v26  }
  0x87   :  { %58 = vst.msk [vmem:[#allocation0] sm:$0x1] %vm57_vm9, %v56_v18  }
  0x8c   :  { %v62_v27 = vpop.permute.xlu0 %61   ;;  %v68_v28 = vpop.permute.xlu1 %67  }
  0x8d   :  { %64 = vst.msk [vmem:[#allocation0] sm:$0x1] %vm63_vm10, %v62_v27  }
  0x8e   :  { %70 = vst.msk [vmem:[#allocation0] sm:$0x1] %vm69_vm11, %v68_v28  }
  0x8f   :  { %76 = vst.msk [vmem:[#allocation0] sm:$0x1] %vm75_vm12, %v74_v21  }
  0x94   :  { %v80_v29 = vpop.permute.xlu0 %79   ;;  %v86_v30 = vpop.permute.xlu1 %85  }
  0x95   :  { %82 = vst.msk [vmem:[#allocation0] sm:$0x1] %vm81_vm13, %v80_v29  }
  0x96   :  { %88 = vst.msk [vmem:[#allocation0] sm:$0x1] %vm87_vm14, %v86_v30  }
  0x97   :  { %94 = vst.msk [vmem:[#allocation0] sm:$0x1] %vm93_vm15, %v92_v24  }
  0x9e   :  { %v97_v31 = vld [vmem:[#allocation0] sm:$0x1] }
  0x9f   :  { %100 = vst [vmem:[%s208_s1] sm:$0x1] %v97_v31 }

// kernel: single_conv_pcdeq1_forward.1
= control target key start
LH: loop header
LB: loop body
LE: loop exit
PB: predicated region body
PF: predicated region fallthrough
CT: control target
= control target key end

     0   :  { %s1049_s0 = inlined_call_operand.vmem [shape: f32[32,256], index: 0, kind: input, shape index: {}]   ;;  %s1050_s1 = inlined_call_operand.vmem [shape: f32[256,384], index: 1, kind: input, shape index: {}]   ;;  %s1051_s2 = inlined_call_operand.vmem [shape: f32[1,128], index: 2, kind: input, shape index: {}]   ;;  %s1052_s3 = inlined_call_operand.vmem [shape: f32[256,10], index: 3, kind: input, shape index: {}]   ;;  %s1053_s4 = inlined_call_operand.vmem [shape: f32[1,10], index: 4, kind: input, shape index: {}]   ;;  %s1054_s5 = inlined_call_operand.hbm [shape: f32[2,10], index: 5, kind: output, shape index: {}]  }
   0x1   :  { %v74_v0 = vld [vmem:[%s1050_s1 + $0x168] sm:$0xff]  ;;  %v71_v2 = vld [vmem:[%s1050_s1 + $0x150] sm:$0xff]  ;;  %v68_v4 = vld [vmem:[%s1050_s1 + $0x138] sm:$0xff] }
   0x2   :  { %v122_v1 = vld [vmem:[%s1050_s1 + $0x2e8] sm:$0xff]  ;;  %125 = vmatpush.msra.mxu0 %v74_v0  ;;  %v119_v3 = vld [vmem:[%s1050_s1 + $0x2d0] sm:$0xff]  ;;  %v116_v5 = vld [vmem:[%s1050_s1 + $0x2b8] sm:$0xff] }
   0x3   :  { %154 = vmatpush.msra.mxu1 %v122_v1  ;;  %v65_v6 = vld [vmem:[%s1050_s1 + $0x120] sm:$0xff]  ;;  %v62_v8 = vld [vmem:[%s1050_s1 + $0x108] sm:$0xff]  ;;  %v59_v10 = vld [vmem:[%s1050_s1 + $0xf0] sm:$0xff] }
   0x4   :  { %126 = vmatpush.msra.mxu0 %v71_v2  ;;  %v113_v7 = vld [vmem:[%s1050_s1 + $0x2a0] sm:$0xff]  ;;  %v110_v9 = vld [vmem:[%s1050_s1 + $0x288] sm:$0xff]  ;;  %v107_v11 = vld [vmem:[%s1050_s1 + $0x270] sm:$0xff] }
   0x5   :  { %155 = vmatpush.msra.mxu1 %v119_v3  ;;  %v75_v12 = vld [vmem:[%s1050_s1 + $0x170] sm:$0xff]  ;;  %v56_v14 = vld [vmem:[%s1050_s1 + $0xd8] sm:$0xff]  ;;  %v53_v17 = vld [vmem:[%s1050_s1 + $0xc0] sm:$0xff] }
   0x6   :  { %127 = vmatpush.msra.mxu0 %v68_v4  ;;  %v123_v13 = vld [vmem:[%s1050_s1 + $0x2f0] sm:$0xff]  ;;  %v104_v15 = vld [vmem:[%s1050_s1 + $0x258] sm:$0xff]  ;;  %183 = vmatpush.msra.mxu2 %v75_v12  ;;  %v101_v19 = vld [vmem:[%s1050_s1 + $0x240] sm:$0xff] }
   0x7   :  { %156 = vmatpush.msra.mxu1 %v116_v5  ;;  %212 = vmatpush.msra.mxu3 %v123_v13  ;;  %v72_v16 = vld [vmem:[%s1050_s1 + $0x158] sm:$0xff]  ;;  %v69_v20 = vld [vmem:[%s1050_s1 + $0x140] sm:$0xff]  ;;  %v50_v22 = vld [vmem:[%s1050_s1 + $0xa8] sm:$0xff] }
   0x8   :  { %128 = vmatpush.msra.mxu0 %v65_v6  ;;  %v120_v18 = vld [vmem:[%s1050_s1 + $0x2d8] sm:$0xff]  ;;  %184 = vmatpush.msra.mxu2 %v72_v16  ;;  %v117_v21 = vld [vmem:[%s1050_s1 + $0x2c0] sm:$0xff]  ;;  %v98_v23 = vld [vmem:[%s1050_s1 + $0x228] sm:$0xff] }
   0x9   :  { %157 = vmatpush.msra.mxu1 %v113_v7  ;;  %213 = vmatpush.msra.mxu3 %v120_v18  ;;  %v66_v24 = vld [vmem:[%s1050_s1 + $0x128] sm:$0xff]  ;;  %v63_v26 = vld [vmem:[%s1050_s1 + $0x110] sm:$0xff]  ;;  %v60_v30 = vld [vmem:[%s1050_s1 + $0xf8] sm:$0xff] }
   0xa   :  { %129 = vmatpush.msra.mxu0 %v62_v8  ;;  %185 = vmatpush.msra.mxu2 %v69_v20  ;;  %v114_v25 = vld [vmem:[%s1050_s1 + $0x2a8] sm:$0xff]  ;;  %v111_v27 = vld [vmem:[%s1050_s1 + $0x290] sm:$0xff]  ;;  %v108_v31 = vld [vmem:[%s1050_s1 + $0x278] sm:$0xff] }
   0xb   :  { %158 = vmatpush.msra.mxu1 %v110_v9  ;;  %214 = vmatpush.msra.mxu3 %v117_v21  ;;  %v47_v28 = vld [vmem:[%s1050_s1 + $0x90] sm:$0xff]  ;;  %v44_v32 = vld [vmem:[%s1050_s1 + $0x78] sm:$0xff]  ;;  %v57_v34 = vld [vmem:[%s1050_s1 + $0xe0] sm:$0xff] }
   0xc   :  { %130 = vmatpush.msra.mxu0 %v59_v10  ;;  %v95_v29 = vld [vmem:[%s1050_s1 + $0x210] sm:$0xff]  ;;  %186 = vmatpush.msra.mxu2 %v66_v24  ;;  %v92_v33 = vld [vmem:[%s1050_s1 + $0x1f8] sm:$0xff]  ;;  %v105_v35 = vld [vmem:[%s1050_s1 + $0x260] sm:$0xff] }
   0xd   :  { %159 = vmatpush.msra.mxu1 %v107_v11  ;;  %215 = vmatpush.msra.mxu3 %v114_v25  ;;  %v41_v36 = vld [vmem:[%s1050_s1 + $0x60] sm:$0xff]  ;;  %v54_v38 = vld [vmem:[%s1050_s1 + $0xc8] sm:$0xff]  ;;  %v51_v42 = vld [vmem:[%s1050_s1 + $0xb0] sm:$0xff] }
   0xe   :  { %131 = vmatpush.msra.mxu0 %v56_v14  ;;  %187 = vmatpush.msra.mxu2 %v63_v26  ;;  %v89_v37 = vld [vmem:[%s1050_s1 + $0x1e0] sm:$0xff]  ;;  %v102_v39 = vld [vmem:[%s1050_s1 + $0x248] sm:$0xff]  ;;  %v99_v43 = vld [vmem:[%s1050_s1 + $0x230] sm:$0xff] }
   0xf   :  { %160 = vmatpush.msra.mxu1 %v104_v15  ;;  %216 = vmatpush.msra.mxu3 %v111_v27  ;;  %v38_v40 = vld [vmem:[%s1050_s1 + $0x48] sm:$0xff]  ;;  %v35_v44 = vld [vmem:[%s1050_s1 + $0x30] sm:$0xff]  ;;  %v48_v46 = vld [vmem:[%s1050_s1 + $0x98] sm:$0xff] }
  0x10   :  { %132 = vmatpush.msra.mxu0 %v53_v17  ;;  %188 = vmatpush.msra.mxu2 %v60_v30  ;;  %v86_v41 = vld [vmem:[%s1050_s1 + $0x1c8] sm:$0xff]  ;;  %v83_v45 = vld [vmem:[%s1050_s1 + $0x1b0] sm:$0xff]  ;;  %v96_v47 = vld [vmem:[%s1050_s1 + $0x218] sm:$0xff] }
  0x11   :  { %161 = vmatpush.msra.mxu1 %v101_v19  ;;  %217 = vmatpush.msra.mxu3 %v108_v31  ;;  %v32_v48 = vld [vmem:[%s1050_s1 + $0x18] sm:$0xff]  ;;  %v45_v50 = vld [vmem:[%s1050_s1 + $0x80] sm:$0xff]  ;;  %v716_v55 = vld [vmem:[%s1049_s0 + $0x8] sm:$0xff] }
  0x12   :  { %133 = vmatpush.msra.mxu0 %v50_v22  ;;  %189 = vmatpush.msra.mxu2 %v57_v34  ;;  %v80_v49 = vld [vmem:[%s1050_s1 + $0x198] sm:$0xff]  ;;  %v93_v51 = vld [vmem:[%s1050_s1 + $0x200] sm:$0xff]  ;;  %v42_v58 = vld [vmem:[%s1050_s1 + $0x68] sm:$0xff] }
  0x13   :  { %162 = vmatpush.msra.mxu1 %v98_v23  ;;  %218 = vmatpush.msra.mxu3 %v105_v35  ;;  %v29_v52 = vld [vmem:[%s1050_s1] sm:$0xff]  ;;  %v76_v56 = vld [vmem:[%s1050_s1 + $0x178] sm:$0xff]  ;;  %v90_v59 = vld [vmem:[%s1050_s1 + $0x1e8] sm:$0xff] }
  0x14   :  { %134 = vmatpush.msra.mxu0 %v47_v28  ;;  %190 = vmatpush.msra.mxu2 %v54_v38  ;;  %v77_v53 = vld [vmem:[%s1050_s1 + $0x180] sm:$0xff]  ;;  %v124_v57 = vld [vmem:[%s1050_s1 + $0x2f8] sm:$0xff]  ;;  %v70_v62 = vld [vmem:[%s1050_s1 + $0x148] sm:$0xff] }
  0x15   :  { %163 = vmatpush.msra.mxu1 %v95_v29  ;;  %219 = vmatpush.msra.mxu3 %v102_v39  ;;  %v711_v54 = vld [vmem:[%s1049_s0] sm:$0xff]  ;;  %v39_v63 = vld [vmem:[%s1050_s1 + $0x50] sm:$0xff]  ;;  %v118_v1 = vld [vmem:[%s1050_s1 + $0x2c8] sm:$0xff] }
  0x16   :  { %135 = vmatpush.msra.mxu0 %v44_v32  ;;  %191 = vmatpush.msra.mxu2 %v51_v42  ;;  %v73_v60 = vld [vmem:[%s1050_s1 + $0x160] sm:$0xff]  ;;  %v87_v0 = vld [vmem:[%s1050_s1 + $0x1d0] sm:$0xff]  ;;  %v36_v2 = vld [vmem:[%s1050_s1 + $0x38] sm:$0xff] }
  0x17   :  { %164 = vmatpush.msra.mxu1 %v92_v33  ;;  %220 = vmatpush.msra.mxu3 %v99_v43  ;;  %v121_v61 = vld [vmem:[%s1050_s1 + $0x2e0] sm:$0xff]  ;;  %v84_v3 = vld [vmem:[%s1050_s1 + $0x1b8] sm:$0xff] }
  0x18   :  { %136 = vmatpush.msra.mxu0 %v41_v36  ;;  %192 = vmatpush.msra.mxu2 %v48_v46 }
  0x19   :  { %165 = vmatpush.msra.mxu1 %v89_v37  ;;  %221 = vmatpush.msra.mxu3 %v96_v47 }
  0x1a   :  { %137 = vmatpush.msra.mxu0 %v38_v40  ;;  %193 = vmatpush.msra.mxu2 %v45_v50 }
  0x1b   :  { %166 = vmatpush.msra.mxu1 %v86_v41  ;;  %222 = vmatpush.msra.mxu3 %v93_v51 }
  0x1c   :  { %138 = vmatpush.msra.mxu0 %v35_v44  ;;  %194 = vmatpush.msra.mxu2 %v42_v58 }
  0x1d   :  { %167 = vmatpush.msra.mxu1 %v83_v45  ;;  %223 = vmatpush.msra.mxu3 %v90_v59 }
  0x1e   :  { %139 = vmatpush.msra.mxu0 %v32_v48 }
  0x1f   :  { %168 = vmatpush.msra.mxu1 %v80_v49 }
  0x20   :  { %140 = vmatpush.msra.mxu0 %v29_v52 }
  0x21   :  { %169 = vmatpush.msra.mxu1 %v77_v53  ;;  %141 = vmatmul.f32.vlgmr.msra.gmra.mxu0 %v711_v54 }
  0x22   :  { %170 = vmatmul.f32.vlgmr.msra.gmra.mxu1 %v716_v55  ;;  %241 = vmatpush.msrb.mxu0 %v76_v56 }
  0x23   :  { %270 = vmatpush.msrb.mxu1 %v124_v57 }
  0x24   :  { %242 = vmatpush.msrb.mxu0 %v73_v60 }
  0x25   :  { %271 = vmatpush.msrb.mxu1 %v121_v61 }
  0x26   :  { %10 = vsyncpa [#allocation3], 0  ;;  %v67_v4 = vld [vmem:[%s1050_s1 + $0x130] sm:$0xff]  ;;  %195 = vmatpush.msra.mxu2 %v39_v63  ;;  %224 = vmatpush.msra.mxu3 %v87_v0  ;;  %v770_v7 = vld [vmem:[%s1049_s0 + $0x18] sm:$0xff]  ;;  %v299_v52 = vlaneseq  ;;  %vm389_vm4 = vcmask 1040384   ;;  %s515_s11 = smov [#allocation2]  }
  0x27   :  { %v115_v5 = vld [vmem:[%s1050_s1 + $0x2b0] sm:$0xff]  ;;  %243 = vmatpush.msrb.mxu0 %v70_v62  ;;  %272 = vmatpush.msrb.mxu1 %v118_v1  ;;  %v64_v8 = vld [vmem:[%s1050_s1 + $0x118] sm:$0xff]  ;;  %v33_v10 = vld [vmem:[%s1050_s1 + $0x20] sm:$0xff]  ;;  %s475_s12 = sshll.u32 %s515_s11, 4  ;;  %s477_s15 = sshll.u32 %s1054_s5, 4  ;;  %vm468_vm5 = vcmask 74752   ;;  %s476_s12 = int_to_ptr.vmem [resolvable:$true] %s475_s12  ;;  %s478_s15 = int_to_ptr.hbm [resolvable:$true] %s477_s15 }
  0x28   :  { %v765_v6 = vld [vmem:[%s1049_s0 + $0x10] sm:$0xff]  ;;  %v112_v9 = vld [vmem:[%s1050_s1 + $0x298] sm:$0xff]  ;;  %196 = vmatpush.msra.mxu2 %v36_v2  ;;  %225 = vmatpush.msra.mxu3 %v84_v3  ;;  %v81_v11 = vld [vmem:[%s1050_s1 + $0x1a0] sm:$0xff]  ;;  %v913_v59 = vand.u32 127, %v299_v52 }
  0x29   :  { %244 = vmatpush.msrb.mxu0 %v67_v4  ;;  %273 = vmatpush.msrb.mxu1 %v115_v5  ;;  %v61_v12 = vld [vmem:[%s1050_s1 + $0x100] sm:$0xff]  ;;  %v30_v14 = vld [vmem:[%s1050_s1 + $0x8] sm:$0xff]  ;;  %v55_v18 = vld [vmem:[%s1050_s1 + $0xd0] sm:$0xff] }
  0x2a   :  { %144 = vmatmul.f32.gmra.mxu0 %v765_v6  ;;  %173 = vmatmul.f32.gmra.mxu1 %v770_v7  ;;  %v109_v13 = vld [vmem:[%s1050_s1 + $0x280] sm:$0xff]  ;;  %v78_v15 = vld [vmem:[%s1050_s1 + $0x188] sm:$0xff]  ;;  %v103_v19 = vld [vmem:[%s1050_s1 + $0x250] sm:$0xff]  ;;  %vm301_vm0 = vcmp.lt.s32.totalorder %v913_v59, 120  ;;  %vm308_vm1 = vcmp.ge.s32.totalorder %v913_v59, 8 }
  0x2b   :  { %245 = vmatpush.msrb.mxu0 %v64_v8  ;;  %274 = vmatpush.msrb.mxu1 %v112_v9  ;;  %v58_v16 = vld [vmem:[%s1050_s1 + $0xe8] sm:$0xff]  ;;  %v25_v20 = vld [vmem:[%s1049_s0 + $0x20] sm:$0xff]  ;;  %v52_v22 = vld [vmem:[%s1050_s1 + $0xb8] sm:$0xff] }
  0x2c   :  { %v106_v17 = vld [vmem:[%s1050_s1 + $0x268] sm:$0xff]  ;;  %197 = vmatpush.msra.mxu2 %v33_v10  ;;  %226 = vmatpush.msra.mxu3 %v81_v11  ;;  %v100_v23 = vld [vmem:[%s1050_s1 + $0x238] sm:$0xff]  ;;  %v49_v24 = vld [vmem:[%s1050_s1 + $0xa0] sm:$0xff] }
  0x2d   :  { %246 = vmatpush.msrb.mxu0 %v61_v12  ;;  %275 = vmatpush.msrb.mxu1 %v109_v13  ;;  %v26_v21 = vld [vmem:[%s1049_s0 + $0x28] sm:$0xff]  ;;  %v97_v25 = vld [vmem:[%s1050_s1 + $0x220] sm:$0xff]  ;;  %v43_v28 = vld [vmem:[%s1050_s1 + $0x70] sm:$0xff] }
  0x2e   :  { %198 = vmatpush.msra.mxu2 %v30_v14  ;;  %227 = vmatpush.msra.mxu3 %v78_v15  ;;  %v46_v26 = vld [vmem:[%s1050_s1 + $0x88] sm:$0xff]  ;;  %v91_v29 = vld [vmem:[%s1050_s1 + $0x1f0] sm:$0xff]  ;;  %v28_v31 = vld [vmem:[%s1049_s0 + $0x38] sm:$0xff] }
  0x2f   :  { %247 = vmatpush.msrb.mxu0 %v58_v16  ;;  %276 = vmatpush.msrb.mxu1 %v106_v17  ;;  %v94_v27 = vld [vmem:[%s1050_s1 + $0x208] sm:$0xff]  ;;  %v27_v30 = vld [vmem:[%s1049_s0 + $0x30] sm:$0xff]  ;;  %v40_v32 = vld [vmem:[%s1050_s1 + $0x58] sm:$0xff] }
  0x30   :  { %199 = vmatmul.f32.vlgmr.msra.gmra.mxu2 %v711_v54  ;;  %228 = vmatmul.f32.vlgmr.msra.gmra.mxu3 %v716_v55  ;;  %v88_v33 = vld [vmem:[%s1050_s1 + $0x1d8] sm:$0xff]  ;;  %v37_v34 = vld [vmem:[%s1050_s1 + $0x40] sm:$0xff]  ;;  %v34_v36 = vld [vmem:[%s1050_s1 + $0x28] sm:$0xff] }
  0x31   :  { %248 = vmatpush.msrb.mxu0 %v55_v18  ;;  %277 = vmatpush.msrb.mxu1 %v103_v19  ;;  %v85_v35 = vld [vmem:[%s1050_s1 + $0x1c0] sm:$0xff]  ;;  %v82_v37 = vld [vmem:[%s1050_s1 + $0x1a8] sm:$0xff]  ;;  %v31_v38 = vld [vmem:[%s1050_s1 + $0x10] sm:$0xff] }
  0x32   :  { %147 = vmatmul.f32.gmra.mxu0 %v25_v20  ;;  %176 = vmatmul.f32.gmra.mxu1 %v26_v21  ;;  %v79_v39 = vld [vmem:[%s1050_s1 + $0x190] sm:$0xff]  ;;  %v407_v50 = vld [vmem:[%s1052_s3 + $0x78] sm:$0xff]  ;;  %v421_v56 = vld [vmem:[%s1052_s3 + $0xe8] sm:$0xff] }
  0x33   :  { %249 = vmatpush.msrb.mxu0 %v52_v22  ;;  %278 = vmatpush.msrb.mxu1 %v100_v23  ;;  %v423_v51 = vld [vmem:[%s1052_s3 + $0xf8] sm:$0xff]  ;;  %v406_v53 = vld [vmem:[%s1052_s3 + $0x70] sm:$0xff]  ;;  %v404_v60 = vld [vmem:[%s1052_s3 + $0x60] sm:$0xff] }
  0x34   :  { %428 = vmatpush.msrb.mxu2 %v407_v50  ;;  %448 = vmatpush.msrb.mxu3 %v423_v51  ;;  %v420_v61 = vld [vmem:[%s1052_s3 + $0xe0] sm:$0xff]  ;;  %v403_v0 = vld [vmem:[%s1052_s3 + $0x58] sm:$0xff]  ;;  %v402_v4 = vld [vmem:[%s1052_s3 + $0x50] sm:$0xff] }
  0x35   :  { %250 = vmatpush.msrb.mxu0 %v49_v24  ;;  %279 = vmatpush.msrb.mxu1 %v97_v25  ;;  %v419_v1 = vld [vmem:[%s1052_s3 + $0xd8] sm:$0xff]  ;;  %v418_v5 = vld [vmem:[%s1052_s3 + $0xd0] sm:$0xff]  ;;  %v400_v11 = vld [vmem:[%s1052_s3 + $0x40] sm:$0xff] }
  0x36   :  { %429 = vmatpush.msrb.mxu2 %v406_v53  ;;  %v416_v12 = vld [vmem:[%s1052_s3 + $0xc0] sm:$0xff]  ;;  %v399_v15 = vld [vmem:[%s1052_s3 + $0x38] sm:$0xff]  ;;  %v397_v25 = vld [vmem:[%s1052_s3 + $0x28] sm:$0xff] }
  0x37   :  { %251 = vmatpush.msrb.mxu0 %v46_v26  ;;  %280 = vmatpush.msrb.mxu1 %v94_v27  ;;  %v415_v16 = vld [vmem:[%s1052_s3 + $0xb8] sm:$0xff]  ;;  %v413_v26 = vld [vmem:[%s1052_s3 + $0xa8] sm:$0xff] }
  0x38   :  { %202 = vmatmul.f32.gmra.mxu2 %v765_v6  ;;  %231 = vmatmul.f32.gmra.mxu3 %v770_v7 }
  0x39   :  { %252 = vmatpush.msrb.mxu0 %v43_v28  ;;  %281 = vmatpush.msrb.mxu1 %v91_v29 }
  0x3a   :  { %150 = vmatmul.f32.gmra.mxu0 %v27_v30  ;;  %179 = vmatmul.f32.gmra.mxu1 %v28_v31 }
  0x3b   :  { %253 = vmatpush.msrb.mxu0 %v40_v32  ;;  %282 = vmatpush.msrb.mxu1 %v88_v33  ;;  %v412_v32 = vld [vmem:[%s1052_s3 + $0xa0] sm:$0xff]  ;;  %v984_v33 = vshrl.u32 %v299_v52, 7 }
  0x3d   :  { %254 = vmatpush.msrb.mxu0 %v37_v34  ;;  %283 = vmatpush.msrb.mxu1 %v85_v35  ;;  %v395_v35 = vld [vmem:[%s1052_s3 + $0x18] sm:$0xff]  ;;  %vm338_vm2 = vcmp.lt.s32.totalorder %v984_v33, 7  ;;  %vm329_vm3 = vcmp.lt.s32.totalorder %v984_v33, 1 }
  0x3f   :  { %255 = vmatpush.msrb.mxu0 %v34_v36  ;;  %284 = vmatpush.msrb.mxu1 %v82_v37  ;;  %v411_v36 = vld [vmem:[%s1052_s3 + $0x98] sm:$0xff] }
  0x40   :  { %205 = vmatmul.f32.gmra.mxu2 %v25_v20  ;;  %234 = vmatmul.f32.gmra.mxu3 %v26_v21 }
  0x41   :  { %256 = vmatpush.msrb.mxu0 %v31_v38  ;;  %285 = vmatpush.msrb.mxu1 %v79_v39 }
  0x42   :  { %257 = vmatmul.f32.vlgmr.msrb.gmra.mxu0 %v711_v54  ;;  %286 = vmatmul.f32.vlgmr.msrb.gmra.mxu1 %v716_v55  ;;  %v422_v54 = vld [vmem:[%s1052_s3 + $0xf0] sm:$0xff]  ;;  %v405_v55 = vld [vmem:[%s1052_s3 + $0x68] sm:$0xff] }
  0x43   :  { %449 = vmatpush.msrb.mxu3 %v422_v54  ;;  %430 = vmatpush.msrb.mxu2 %v405_v55 }
  0x45   :  { %450 = vmatpush.msrb.mxu3 %v421_v56  ;;  %431 = vmatpush.msrb.mxu2 %v404_v60  ;;  %v393_v56 = vld [vmem:[%s1052_s3 + $0x8] sm:$0xff] }
  0x47   :  { %451 = vmatpush.msrb.mxu3 %v420_v61  ;;  %432 = vmatpush.msrb.mxu2 %v403_v0 }
  0x48   :  { %208 = vmatmul.f32.gmra.mxu2 %v27_v30  ;;  %237 = vmatmul.f32.gmra.mxu3 %v28_v31 }
  0x49   :  { %452 = vmatpush.msrb.mxu3 %v419_v1  ;;  %433 = vmatpush.msrb.mxu2 %v402_v4 }
  0x4a   :  { %260 = vmatmul.f32.gmra.mxu0 %v765_v6  ;;  %289 = vmatmul.f32.gmra.mxu1 %v770_v7  ;;  %v401_v6 = vld [vmem:[%s1052_s3 + $0x48] sm:$0xff] }
  0x4b   :  { %453 = vmatpush.msrb.mxu3 %v418_v5  ;;  %v417_v7 = vld [vmem:[%s1052_s3 + $0xc8] sm:$0xff]  ;;  %434 = vmatpush.msrb.mxu2 %v401_v6 }
  0x4d   :  { %454 = vmatpush.msrb.mxu3 %v417_v7  ;;  %435 = vmatpush.msrb.mxu2 %v400_v11 }
  0x4f   :  { %455 = vmatpush.msrb.mxu3 %v416_v12  ;;  %436 = vmatpush.msrb.mxu2 %v399_v15 }
  0x51   :  { %456 = vmatpush.msrb.mxu3 %v415_v16 }
  0x52   :  { %263 = vmatmul.f32.gmra.mxu0 %v25_v20  ;;  %292 = vmatmul.f32.gmra.mxu1 %v26_v21  ;;  %v398_v20 = vld [vmem:[%s1052_s3 + $0x30] sm:$0xff] }
  0x53   :  { %v414_v21 = vld [vmem:[%s1052_s3 + $0xb0] sm:$0xff]  ;;  %437 = vmatpush.msrb.mxu2 %v398_v20 }
  0x54   :  { %457 = vmatpush.msrb.mxu3 %v414_v21 }
  0x55   :  { %438 = vmatpush.msrb.mxu2 %v397_v25 }
  0x56   :  { %458 = vmatpush.msrb.mxu3 %v413_v26 }
  0x58   :  { %459 = vmatpush.msrb.mxu3 %v412_v32 }
  0x5a   :  { %266 = vmatmul.f32.gmra.mxu0 %v27_v30  ;;  %295 = vmatmul.f32.gmra.mxu1 %v28_v31  ;;  %v396_v31 = vld [vmem:[%s1052_s3 + $0x20] sm:$0xff] }
  0x5b   :  { %439 = vmatpush.msrb.mxu2 %v396_v31  ;;  %460 = vmatpush.msrb.mxu3 %v411_v36 }
  0x5d   :  { %440 = vmatpush.msrb.mxu2 %v395_v35 }
  0x9e   :  { %v878_v40 = vpop.f32.mrf.mxu0 }
  0x9f   :  { %v880_v41 = vpop.f32.mrf.mxu1 }
  0xa0   :  { %v172_v24 = vadd.f32 %v880_v41, %v878_v40 }
  0xa7   :  { %v882_v42 = vpop.f32.mrf.mxu0  ;;  %v884_v43 = vpop.f32.mrf.mxu1 }
  0xa8   :  { %v175_v28 = vadd.f32 %v884_v43, %v882_v42 }
  0xaf   :  { %v886_v44 = vpop.f32.mrf.mxu0  ;;  %v888_v45 = vpop.f32.mrf.mxu1 }
  0xb0   :  { %v178_v4 = vadd.f32 %v888_v45, %v886_v44 }
  0xb3   :  { %v200_v46 = vpop.f32.mrf.mxu2  ;;  %v229_v47 = vpop.f32.mrf.mxu3 }
  0xb4   :  { %v230_v2 = vadd.f32 %v229_v47, %v200_v46  ;;  %v394_v46 = vld [vmem:[%s1052_s3 + $0x10] sm:$0xff] }
  0xb5   :  { %v410_v47 = vld [vmem:[%s1052_s3 + $0x90] sm:$0xff]  ;;  %441 = vmatpush.msrb.mxu2 %v394_v46 }
  0xb6   :  { %v304_v8 = vsel %vm301_vm0, %v230_v2, -1e+30  ;;  %461 = vmatpush.msrb.mxu3 %v410_v47 }
  0xb7   :  { %v890_v48 = vpop.f32.mrf.mxu0  ;;  %v892_v49 = vpop.f32.mrf.mxu1  ;;  %442 = vmatpush.msrb.mxu2 %v393_v56 }
  0xbb   :  { %v203_v57 = vpop.f32.mrf.mxu2  ;;  %v232_v58 = vpop.f32.mrf.mxu3 }
  0xbc   :  { %v233_v10 = vadd.f32 %v232_v58, %v203_v57  ;;  %v409_v57 = vld [vmem:[%s1052_s3 + $0x88] sm:$0xff] }
  0xbd   :  { %462 = vmatpush.msrb.mxu3 %v409_v57 }
  0xbe   :  { %v305_v22 = vsel %vm301_vm0, %v233_v10, -1e+30 }
  0xbf   :  { %v258_v62 = vpop.f32.mrf.mxu0  ;;  %v287_v63 = vpop.f32.mrf.mxu1 }
  0xc0   :  { %v288_v3 = vadd.f32 %v287_v63, %v258_v62  ;;  %v392_v62 = vld [vmem:[%s1052_s3] sm:$0xff] }
  0xc1   :  { %v408_v63 = vld [vmem:[%s1052_s3 + $0x80] sm:$0xff]  ;;  %443 = vmatpush.msrb.mxu2 %v392_v62 }
  0xc2   :  { %v311_v9 = vsel %vm308_vm1, %v288_v3, -1e+30  ;;  %463 = vmatpush.msrb.mxu3 %v408_v63 }
  0xc3   :  { %v206_v13 = vpop.f32.mrf.mxu2  ;;  %v235_v14 = vpop.f32.mrf.mxu3  ;;  %v315_v17 = vmax.f32 %v304_v8, %v311_v9  ;;  %v487_v8 = vld [vmem:[%s1051_s2] ss:$0 sm:$0xff] }
  0xc4   :  { %v236_v37 = vadd.f32 %v235_v14, %v206_v13  ;;  %v181_v14 = vadd.f32 %v892_v49, %v890_v48 }
  0xc5   :  { %v319_v29 = vmax.f32 %v172_v24, %v315_v17 }
  0xc6   :  { %v306_v58 = vsel %vm301_vm0, %v236_v37, -1e+30 }
  0xc7   :  { %v261_v18 = vpop.f32.mrf.mxu0  ;;  %v290_v19 = vpop.f32.mrf.mxu1  ;;  %v323_v38 = vrot.slane %v319_v29, 7  ;;  %v334_v39 = vrot.slane %v319_v29, 1 }
  0xc8   :  { %v291_v23 = vadd.f32 %v290_v19, %v261_v18 }
  0xc9   :  { %v333_v61 = vsel %vm329_vm3, -1e+30, %v323_v38 }
  0xca   :  { %v312_v27 = vsel %vm308_vm1, %v291_v23, -1e+30 }
  0xcb   :  { %v316_v30 = vmax.f32 %v305_v22, %v312_v27  ;;  %v209_v54 = vpop.f32.mrf.mxu2  ;;  %v238_v55 = vpop.f32.mrf.mxu3 }
  0xcc   :  { %v239_v2 = vadd.f32 %v238_v55, %v209_v54 }
  0xcd   :  { %v320_v34 = vmax.f32 %v175_v28, %v316_v30 }
  0xce   :  { %v307_v9 = vsel %vm301_vm0, %v239_v2, -1e+30 }
  0xcf   :  { %v324_v40 = vrot.slane %v320_v34, 7  ;;  %v335_v41 = vrot.slane %v320_v34, 1  ;;  %v264_v42 = vpop.f32.mrf.mxu0  ;;  %v293_v43 = vpop.f32.mrf.mxu1 }
  0xd0   :  { %v294_v50 = vadd.f32 %v293_v43, %v264_v42 }
  0xd1   :  { %v332_v51 = vsel %vm329_vm3, %v323_v38, %v324_v40  ;;  %v341_v52 = vsel %vm338_vm2, %v335_v41, -1e+30  ;;  %v342_v53 = vsel %vm338_vm2, %v334_v39, %v335_v41 }
  0xd2   :  { %v313_v60 = vsel %vm308_vm1, %v294_v50, -1e+30  ;;  %v343_v0 = vmax.f32 %v333_v61, %v342_v53  ;;  %v344_v1 = vmax.f32 %v332_v51, %v341_v52  ;;  %v488_v61 = vld [vmem:[%s1053_s4] ss:$0 sm:$0xff] }
  0xd3   :  { %v317_v3 = vmax.f32 %v306_v58, %v313_v60 }
  0xd4   :  { %v348_v7 = vmax.f32 %v320_v34, %v344_v1  ;;  %v347_v11 = vmax.f32 %v319_v29, %v343_v0 }
  0xd5   :  { %v321_v12 = vmax.f32 %v178_v4, %v317_v3 }
  0xd6   :  { %v356_v45 = vadd.f32 %v487_v8, %v348_v7  ;;  %v355_v15 = vadd.f32 %v487_v8, %v347_v11 }
  0xd7   :  { %v267_v5 = vpop.f32.mrf.mxu0  ;;  %v296_v6 = vpop.f32.mrf.mxu1  ;;  %v325_v16 = vrot.slane %v321_v12, 7  ;;  %v336_v18 = vrot.slane %v321_v12, 1 }
  0xd8   :  { %v297_v10 = vadd.f32 %v296_v6, %v267_v5  ;;  %v359_v21 = vrot.slane %v355_v15, 4  ;;  %v365_v22 = vrot.slane %v356_v45, 4 }
  0xd9   :  { %v331_v23 = vsel %vm329_vm3, -1e+30, %v325_v16 }
  0xda   :  { %v314_v13 = vsel %vm308_vm1, %v297_v10, -1e+30  ;;  %v360_v28 = vadd.f32 %v359_v21, %v355_v15  ;;  %v366_v29 = vadd.f32 %v365_v22, %v356_v45 }
  0xdb   :  { %v318_v44 = vmax.f32 %v307_v9, %v314_v13 }
  0xdc   :  { %v361_v32 = vrot.slane %v360_v28, 2  ;;  %v367_v35 = vrot.slane %v366_v29, 2 }
  0xdd   :  { %v322_v17 = vmax.f32 %v181_v14, %v318_v44 }
  0xde   :  { %v362_v39 = vadd.f32 %v361_v32, %v360_v28  ;;  %v368_v41 = vadd.f32 %v367_v35, %v366_v29 }
  0xdf   :  { %v326_v19 = vrot.slane %v322_v17, 7  ;;  %v337_v20 = vrot.slane %v322_v17, 1 }
  0xe0   :  { %v363_v46 = vrot.slane %v362_v39, 1  ;;  %v369_v50 = vrot.slane %v368_v41, 1 }
  0xe1   :  { %v330_v59 = vsel %vm329_vm3, %v325_v16, %v326_v19  ;;  %v339_v24 = vsel %vm338_vm2, %v337_v20, -1e+30  ;;  %v340_v48 = vsel %vm338_vm2, %v336_v18, %v337_v20 }
  0xe2   :  { %v345_v49 = vmax.f32 %v331_v23, %v340_v48  ;;  %v346_v25 = vmax.f32 %v330_v59, %v339_v24  ;;  %v364_v54 = vadd.f32 %v363_v46, %v362_v39  ;;  %v370_v56 = vadd.f32 %v369_v50, %v368_v41 }
  0xe4   :  { %v350_v26 = vmax.f32 %v322_v17, %v346_v25  ;;  %v349_v27 = vmax.f32 %v321_v12, %v345_v49 }
  0xe6   :  { %v358_v30 = vadd.f32 %v487_v8, %v350_v26  ;;  %v357_v31 = vadd.f32 %v487_v8, %v349_v27 }
  0xe8   :  { %v371_v34 = vrot.slane %v357_v31, 4  ;;  %v377_v36 = vrot.slane %v358_v30, 4 }
  0xea   :  { %v372_v37 = vadd.f32 %v371_v34, %v357_v31  ;;  %v378_v38 = vadd.f32 %v377_v36, %v358_v30 }
  0xec   :  { %v373_v40 = vrot.slane %v372_v37, 2  ;;  %v379_v42 = vrot.slane %v378_v38, 2 }
  0xee   :  { %v374_v33 = vadd.f32 %v373_v40, %v372_v37  ;;  %v380_v43 = vadd.f32 %v379_v42, %v378_v38 }
  0xf0   :  { %v375_v47 = vrot.slane %v374_v33, 1  ;;  %v381_v51 = vrot.slane %v380_v43, 1 }
  0xf2   :  { %v376_v52 = vadd.f32 %v375_v47, %v374_v33  ;;  %v382_v53 = vadd.f32 %v381_v51, %v380_v43 }
  0xf4   :  { %v385_v55 = vrot.slane %v376_v52, 7  ;;  %v386_v57 = vrot.slane %v382_v53, 7 }
  0xf6   :  { %v390_v58 = vsel %vm389_vm4, %v364_v54, %v385_v55  ;;  %v391_v60 = vsel %vm389_vm4, %v370_v56, %v386_v57 }
  0xf7   :  { %444 = vmatmul.f32.vlgmr.msrb.gmra.mxu2 %v390_v58  ;;  %464 = vmatmul.f32.vlgmr.msrb.gmra.mxu3 %v391_v60 }
 0x17a   :  { %v445_v62 = vpop.f32.mrf.mxu2  ;;  %v465_v0 = vpop.f32.mrf.mxu3 }
 0x17b   :  { %v446_v63 = vadd.f32 %v488_v61, %v445_v62 }
 0x17d   :  { %v466_v1 = vadd.f32 %v465_v0, %v446_v63 }
 0x17f   :  { %469 = vst.msk [vmem:[#allocation2] sm:$0x3] %vm468_vm5, %v466_v1 }
 0x180   :  { %480 = dma.vmem_to_hbm [thread:$0]  %s476_s12, 32, %s478_s15, [#allocation3]  }
 0x181   :  { %513 = dma.done.wait [#allocation3], 32  }
 0x182   :  { %514 = vsyncadd [#allocation3], 4294967264 }
 0x183   :  { %485 = vsyncpa [#allocation3], 1 }

</bundles_post_ra>
